<compile_context>
chip_gen: v5e
topology: v5e:2x2
jax: 0.10.0
libtpu: 0.0.40
codegen_flags: <defaults>
</compile_context>

<pallas_src>
import functools

import jax
import jax.numpy as jnp
from jax.experimental import pallas as pl
from jax.experimental.pallas import tpu as pltpu

LOG_STD_MAX = 2.0
LOG_STD_MIN = -20.0

HIDDEN = 128
N_HIDDEN_LAYERS = 6  # net_arch = [128] * 6


def _round_up(x, m):
    return ((x + m - 1) // m) * m


def _skill_prior_kernel(
    obs_ref,      # [TB, obs_dim]          f32 (full obs, slice folded into w_embed)
    we_ref,       # [obs_dim, 128]         bf16 (zero-padded embed weight)
    be_ref,       # [1, 128]               f32
    wh_ref,       # [6, 128, 128]          bf16 (stacked hidden weights)
    bh_ref,       # [6, 1, 128]            f32
    whead_ref,    # [128, head_pad]        bf16 (fused mu | log_std, lane-padded)
    bhead_ref,    # [1, head_pad]          f32
    out_ref,      # [TB, head_pad]         f32 (cols [0:L) = mu, [L:2L) = std)
    *,
    latent_dim,
):
    # embed_obs: Linear with NO activation (matches the PyTorch forward).
    x = jnp.dot(obs_ref[...].astype(jnp.bfloat16), we_ref[...],
                preferred_element_type=jnp.float32) + be_ref[...]

    # latent_policy: 6 x (Linear(128,128) + ReLU).  Static unroll (short loop).
    # bf16 operands on the MXU, f32 accumulation, f32 bias/ReLU on the VPU.
    for i in range(N_HIDDEN_LAYERS):
        x = jnp.dot(x.astype(jnp.bfloat16), wh_ref[i],
                    preferred_element_type=jnp.float32) + bh_ref[i]
        x = jnp.maximum(x, 0.0)

    # Fused heads: one lane-dense matmul producing [mu | log_std | pad].
    h = jnp.dot(x.astype(jnp.bfloat16), whead_ref[...],
                preferred_element_type=jnp.float32) + bhead_ref[...]

    # Apply clamp+exp only to the log_std columns (col >= latent_dim); padding
    # columns also get exp'd (harmless, sliced off in the wrapper).
    col = jax.lax.broadcasted_iota(jnp.int32, h.shape, 1)
    std = jnp.exp(jnp.clip(h, LOG_STD_MIN, LOG_STD_MAX))
    out_ref[...] = jnp.where(col >= latent_dim, std, h)


def pack_skill_prior_params(params, *, input_obs, obs_dim):
    """One-time packing: bf16 weights, fused+lane-padded head, zero-padded embed."""
    latent_dim = params["w_mu"].shape[1]
    head_pad = max(128, _round_up(2 * latent_dim, 128))

    # Fold obs[:, :input_obs] slice into the embed weight (extra obs dims hit zeros).
    w_embed = jnp.zeros((obs_dim, HIDDEN), jnp.float32)
    w_embed = w_embed.at[:input_obs, :].set(params["w_embed"])

    # Fuse mu / log_std heads and pad the lane dim to a multiple of 128.
    w_head = jnp.zeros((HIDDEN, head_pad), jnp.float32)
    w_head = w_head.at[:, :latent_dim].set(params["w_mu"])
    w_head = w_head.at[:, latent_dim:2 * latent_dim].set(params["w_log_std"])
    b_head = jnp.zeros((1, head_pad), jnp.float32)
    b_head = b_head.at[:, :latent_dim].set(params["b_mu"])
    b_head = b_head.at[:, latent_dim:2 * latent_dim].set(params["b_log_std"])

    return {
        "w_embed": w_embed.astype(jnp.bfloat16),
        "b_embed": params["b_embed"].astype(jnp.float32),
        "w_hidden": params["w_hidden"].astype(jnp.bfloat16),
        "b_hidden": params["b_hidden"].astype(jnp.float32),
        "w_head": w_head.astype(jnp.bfloat16),
        "b_head": b_head.astype(jnp.float32),
    }


@functools.partial(jax.jit, static_argnames=("latent_dim",))
def skill_prior_forward(obs, packed, *, latent_dim):
    """Returns (mu, std) of the output Normal density."""
    obs = obs.astype(jnp.float32)
    B, obs_dim = obs.shape
    L = latent_dim
    head_pad = packed["w_head"].shape[1]

    # Batch tile: multiple of 8 (f32 sublane), capped at 256 for MXU fill.
    TB = min(256, _round_up(max(B, 1), 8))
    B_pad = _round_up(B, TB)
    if B_pad != B:
        obs = jnp.pad(obs, ((0, B_pad - B), (0, 0)))

    grid = (B_pad // TB,)

    out = pl.pallas_call(
        functools.partial(_skill_prior_kernel, latent_dim=L),
        out_shape=jax.ShapeDtypeStruct((B_pad, head_pad), jnp.float32),
        grid=grid,
        in_specs=[
            # obs tiles stream over the batch grid axis.
            pl.BlockSpec((TB, obs_dim), lambda i: (i, 0)),
            # Weights/biases: constant index maps -> VMEM-resident across steps.
            pl.BlockSpec(packed["w_embed"].shape, lambda i: (0, 0)),
            pl.BlockSpec(packed["b_embed"].shape, lambda i: (0, 0)),
            pl.BlockSpec(packed["w_hidden"].shape, lambda i: (0, 0, 0)),
            pl.BlockSpec(packed["b_hidden"].shape, lambda i: (0, 0, 0)),
            pl.BlockSpec(packed["w_head"].shape, lambda i: (0, 0)),
            pl.BlockSpec(packed["b_head"].shape, lambda i: (0, 0)),
        ],
        out_specs=pl.BlockSpec((TB, head_pad), lambda i: (i, 0)),
        compiler_params=pltpu.CompilerParams(
            dimension_semantics=("parallel",)),  # v7x: shard batch tiles over 2 TCs
    )(
        obs,
        packed["w_embed"], packed["b_embed"],
        packed["w_hidden"], packed["b_hidden"],
        packed["w_head"], packed["b_head"],
    )

    mu = out[:B, :L]
    std = out[:B, L:2 * L]
    return mu, std


def init_skill_prior_params(key, input_obs, latent_dim=12):
    """Deterministic synthetic init (PyTorch-style uniform(-1/sqrt(fan_in), ...))."""
    def linear(k, fan_in, fan_out):
        kw, kb = jax.random.split(k)
        bound = 1.0 / jnp.sqrt(jnp.float32(fan_in))
        w = jax.random.uniform(kw, (fan_in, fan_out), jnp.float32, -bound, bound)
        b = jax.random.uniform(kb, (1, fan_out), jnp.float32, -bound, bound)
        return w, b

    keys = jax.random.split(key, 3 + N_HIDDEN_LAYERS)
    w_embed, b_embed = linear(keys[0], input_obs, HIDDEN)

    wh, bh = [], []
    for i in range(N_HIDDEN_LAYERS):
        w, b = linear(keys[1 + i], HIDDEN, HIDDEN)
        wh.append(w)
        bh.append(b)
    w_hidden = jnp.stack(wh)                      # [6, 128, 128]
    b_hidden = jnp.stack(bh)                      # [6, 1, 128]

    w_mu, b_mu = linear(keys[1 + N_HIDDEN_LAYERS], HIDDEN, latent_dim)
    w_log_std, b_log_std = linear(keys[2 + N_HIDDEN_LAYERS], HIDDEN, latent_dim)

    return {
        "w_embed": w_embed, "b_embed": b_embed,
        "w_hidden": w_hidden, "b_hidden": b_hidden,
        "w_mu": w_mu, "b_mu": b_mu,
        "w_log_std": w_log_std, "b_log_std": b_log_std,
    }


def _reference_forward(obs, params, input_obs):
    """Plain-JAX reference emulating the kernel's bf16-operand / f32-accum dots."""
    def mm(a, w):
        return jnp.dot(a.astype(jnp.bfloat16), w.astype(jnp.bfloat16),
                       preferred_element_type=jnp.float32)

    x = mm(obs[:, :input_obs], params["w_embed"]) + params["b_embed"]
    for i in range(N_HIDDEN_LAYERS):
        x = jnp.maximum(mm(x, params["w_hidden"][i]) + params["b_hidden"][i], 0.0)
    mu = mm(x, params["w_mu"]) + params["b_mu"]
    log_std = jnp.clip(mm(x, params["w_log_std"]) + params["b_log_std"],
                       LOG_STD_MIN, LOG_STD_MAX)
    return mu, jnp.exp(log_std)


if __name__ == "__main__":
    key = jax.random.PRNGKey(0)
    k_obs, k_params = jax.random.split(key)

    input_obs = 10      # module slices obs[:, :input_obs]
    obs_total = 16      # obs may carry extra (e.g. goal) dims that get dropped
    batch = 2
    latent_dim = 12

    obs = jax.random.normal(k_obs, (batch, obs_total), jnp.float32)
    params = init_skill_prior_params(k_params, input_obs, latent_dim)
    packed = pack_skill_prior_params(params, input_obs=input_obs, obs_dim=obs_total)

    mu, std = skill_prior_forward(obs, packed, latent_dim=latent_dim)
    jax.block_until_ready((mu, std))

    mu_ref, std_ref = _reference_forward(obs, params, input_obs)
    assert mu.shape == (batch, latent_dim) and std.shape == (batch, latent_dim)
    assert jnp.allclose(mu, mu_ref, atol=1e-3, rtol=1e-3)
    assert jnp.allclose(std, std_ref, atol=1e-3, rtol=1e-3)
    assert bool(jnp.all(std > 0.0))

    print("KERNEL_OK")
</pallas_src>

<mosaic_0001>
module attributes {stable_mosaic.version = 11 : i64} {
  func.func @_skill_prior_kernel(%arg0: i32, %arg1: memref<8x16xf32, #tpu.memory_space<vmem>>, %arg2: memref<16x128xbf16, #tpu.memory_space<vmem>>, %arg3: memref<1x128xf32, #tpu.memory_space<vmem>>, %arg4: memref<6x128x128xbf16, #tpu.memory_space<vmem>>, %arg5: memref<6x1x128xf32, #tpu.memory_space<vmem>>, %arg6: memref<128x128xbf16, #tpu.memory_space<vmem>>, %arg7: memref<1x128xf32, #tpu.memory_space<vmem>>, %arg8: memref<8x128xf32, #tpu.memory_space<vmem>>) attributes {dimension_semantics = [#tpu.dimension_semantics<parallel>], iteration_bounds = array<i64: 1>, scalar_prefetch = 0 : i64, scratch_operands = 0 : i64, tpu.core_type = #tpu.core_type<tc>, window_params = [{transform_indices = @transform_0, window_bounds = array<i64: 8, 16>}, {pipeline_mode = #tpu.pipeline_mode<synchronous>, transform_indices = @transform_1, window_bounds = array<i64: 16, 128>}, {pipeline_mode = #tpu.pipeline_mode<synchronous>, transform_indices = @transform_2, window_bounds = array<i64: 1, 128>}, {pipeline_mode = #tpu.pipeline_mode<synchronous>, transform_indices = @transform_3, window_bounds = array<i64: 6, 128, 128>}, {pipeline_mode = #tpu.pipeline_mode<synchronous>, transform_indices = @transform_4, window_bounds = array<i64: 6, 1, 128>}, {pipeline_mode = #tpu.pipeline_mode<synchronous>, transform_indices = @transform_5, window_bounds = array<i64: 128, 128>}, {pipeline_mode = #tpu.pipeline_mode<synchronous>, transform_indices = @transform_6, window_bounds = array<i64: 1, 128>}, {transform_indices = @transform_7, window_bounds = array<i64: 8, 128>}]} {
    %c0 = arith.constant 0 : index
    %c0_0 = arith.constant 0 : index
    %0 = vector.load %arg1[%c0, %c0_0] : memref<8x16xf32, #tpu.memory_space<vmem>>, vector<8x16xf32>
    %1 = arith.truncf %0 : vector<8x16xf32> to vector<8x16xbf16>
    %c0_1 = arith.constant 0 : index
    %c0_2 = arith.constant 0 : index
    %2 = vector.load %arg2[%c0_1, %c0_2] : memref<16x128xbf16, #tpu.memory_space<vmem>>, vector<16x128xbf16>
    %cst = arith.constant dense<0.000000e+00> : vector<8x128xf32>
    %3 = tpu.matmul %1, %2, %cst {dimension_numbers = #tpu.dot_dimension_numbers<[1], [0], [0], [1], [0, 0, 1, 1], [], []>} : vector<8x16xbf16>, vector<16x128xbf16>, vector<8x128xf32> -> vector<8x128xf32>
    %c0_3 = arith.constant 0 : index
    %c0_4 = arith.constant 0 : index
    %4 = vector.load %arg3[%c0_3, %c0_4] : memref<1x128xf32, #tpu.memory_space<vmem>>, vector<1x128xf32>
    %5 = vector.broadcast %4 : vector<1x128xf32> to vector<8x128xf32>
    %6 = arith.addf %3, %5 : vector<8x128xf32>
    %7 = arith.truncf %6 : vector<8x128xf32> to vector<8x128xbf16>
    %c0_5 = arith.constant 0 : index
    %c0_6 = arith.constant 0 : index
    %c0_7 = arith.constant 0 : index
    %8 = vector.load %arg4[%c0_5, %c0_6, %c0_7] : memref<6x128x128xbf16, #tpu.memory_space<vmem>>, vector<1x128x128xbf16>
    %9 = vector.shape_cast %8 : vector<1x128x128xbf16> to vector<128x128xbf16>
    %cst_8 = arith.constant dense<0.000000e+00> : vector<8x128xf32>
    %10 = tpu.matmul %7, %9, %cst_8 {dimension_numbers = #tpu.dot_dimension_numbers<[1], [0], [0], [1], [0, 0, 1, 1], [], []>} : vector<8x128xbf16>, vector<128x128xbf16>, vector<8x128xf32> -> vector<8x128xf32>
    %c0_9 = arith.constant 0 : index
    %c0_10 = arith.constant 0 : index
    %c0_11 = arith.constant 0 : index
    %11 = vector.load %arg5[%c0_9, %c0_10, %c0_11] : memref<6x1x128xf32, #tpu.memory_space<vmem>>, vector<1x1x128xf32>
    %12 = vector.shape_cast %11 : vector<1x1x128xf32> to vector<1x128xf32>
    %13 = vector.broadcast %12 : vector<1x128xf32> to vector<8x128xf32>
    %14 = arith.addf %10, %13 : vector<8x128xf32>
    %cst_12 = arith.constant 0.000000e+00 : f32
    %15 = vector.broadcast %cst_12 : f32 to vector<8x128xf32>
    %16 = arith.maximumf %14, %15 : vector<8x128xf32>
    %17 = arith.truncf %16 : vector<8x128xf32> to vector<8x128xbf16>
    %c1 = arith.constant 1 : index
    %c0_13 = arith.constant 0 : index
    %c0_14 = arith.constant 0 : index
    %18 = vector.load %arg4[%c1, %c0_13, %c0_14] : memref<6x128x128xbf16, #tpu.memory_space<vmem>>, vector<1x128x128xbf16>
    %19 = vector.shape_cast %18 : vector<1x128x128xbf16> to vector<128x128xbf16>
    %cst_15 = arith.constant dense<0.000000e+00> : vector<8x128xf32>
    %20 = tpu.matmul %17, %19, %cst_15 {dimension_numbers = #tpu.dot_dimension_numbers<[1], [0], [0], [1], [0, 0, 1, 1], [], []>} : vector<8x128xbf16>, vector<128x128xbf16>, vector<8x128xf32> -> vector<8x128xf32>
    %c1_16 = arith.constant 1 : index
    %c0_17 = arith.constant 0 : index
    %c0_18 = arith.constant 0 : index
    %21 = vector.load %arg5[%c1_16, %c0_17, %c0_18] : memref<6x1x128xf32, #tpu.memory_space<vmem>>, vector<1x1x128xf32>
    %22 = vector.shape_cast %21 : vector<1x1x128xf32> to vector<1x128xf32>
    %23 = vector.broadcast %22 : vector<1x128xf32> to vector<8x128xf32>
    %24 = arith.addf %20, %23 : vector<8x128xf32>
    %cst_19 = arith.constant 0.000000e+00 : f32
    %25 = vector.broadcast %cst_19 : f32 to vector<8x128xf32>
    %26 = arith.maximumf %24, %25 : vector<8x128xf32>
    %27 = arith.truncf %26 : vector<8x128xf32> to vector<8x128xbf16>
    %c2 = arith.constant 2 : index
    %c0_20 = arith.constant 0 : index
    %c0_21 = arith.constant 0 : index
    %28 = vector.load %arg4[%c2, %c0_20, %c0_21] : memref<6x128x128xbf16, #tpu.memory_space<vmem>>, vector<1x128x128xbf16>
    %29 = vector.shape_cast %28 : vector<1x128x128xbf16> to vector<128x128xbf16>
    %cst_22 = arith.constant dense<0.000000e+00> : vector<8x128xf32>
    %30 = tpu.matmul %27, %29, %cst_22 {dimension_numbers = #tpu.dot_dimension_numbers<[1], [0], [0], [1], [0, 0, 1, 1], [], []>} : vector<8x128xbf16>, vector<128x128xbf16>, vector<8x128xf32> -> vector<8x128xf32>
    %c2_23 = arith.constant 2 : index
    %c0_24 = arith.constant 0 : index
    %c0_25 = arith.constant 0 : index
    %31 = vector.load %arg5[%c2_23, %c0_24, %c0_25] : memref<6x1x128xf32, #tpu.memory_space<vmem>>, vector<1x1x128xf32>
    %32 = vector.shape_cast %31 : vector<1x1x128xf32> to vector<1x128xf32>
    %33 = vector.broadcast %32 : vector<1x128xf32> to vector<8x128xf32>
    %34 = arith.addf %30, %33 : vector<8x128xf32>
    %cst_26 = arith.constant 0.000000e+00 : f32
    %35 = vector.broadcast %cst_26 : f32 to vector<8x128xf32>
    %36 = arith.maximumf %34, %35 : vector<8x128xf32>
    %37 = arith.truncf %36 : vector<8x128xf32> to vector<8x128xbf16>
    %c3 = arith.constant 3 : index
    %c0_27 = arith.constant 0 : index
    %c0_28 = arith.constant 0 : index
    %38 = vector.load %arg4[%c3, %c0_27, %c0_28] : memref<6x128x128xbf16, #tpu.memory_space<vmem>>, vector<1x128x128xbf16>
    %39 = vector.shape_cast %38 : vector<1x128x128xbf16> to vector<128x128xbf16>
    %cst_29 = arith.constant dense<0.000000e+00> : vector<8x128xf32>
    %40 = tpu.matmul %37, %39, %cst_29 {dimension_numbers = #tpu.dot_dimension_numbers<[1], [0], [0], [1], [0, 0, 1, 1], [], []>} : vector<8x128xbf16>, vector<128x128xbf16>, vector<8x128xf32> -> vector<8x128xf32>
    %c3_30 = arith.constant 3 : index
    %c0_31 = arith.constant 0 : index
    %c0_32 = arith.constant 0 : index
    %41 = vector.load %arg5[%c3_30, %c0_31, %c0_32] : memref<6x1x128xf32, #tpu.memory_space<vmem>>, vector<1x1x128xf32>
    %42 = vector.shape_cast %41 : vector<1x1x128xf32> to vector<1x128xf32>
    %43 = vector.broadcast %42 : vector<1x128xf32> to vector<8x128xf32>
    %44 = arith.addf %40, %43 : vector<8x128xf32>
    %cst_33 = arith.constant 0.000000e+00 : f32
    %45 = vector.broadcast %cst_33 : f32 to vector<8x128xf32>
    %46 = arith.maximumf %44, %45 : vector<8x128xf32>
    %47 = arith.truncf %46 : vector<8x128xf32> to vector<8x128xbf16>
    %c4 = arith.constant 4 : index
    %c0_34 = arith.constant 0 : index
    %c0_35 = arith.constant 0 : index
    %48 = vector.load %arg4[%c4, %c0_34, %c0_35] : memref<6x128x128xbf16, #tpu.memory_space<vmem>>, vector<1x128x128xbf16>
    %49 = vector.shape_cast %48 : vector<1x128x128xbf16> to vector<128x128xbf16>
    %cst_36 = arith.constant dense<0.000000e+00> : vector<8x128xf32>
    %50 = tpu.matmul %47, %49, %cst_36 {dimension_numbers = #tpu.dot_dimension_numbers<[1], [0], [0], [1], [0, 0, 1, 1], [], []>} : vector<8x128xbf16>, vector<128x128xbf16>, vector<8x128xf32> -> vector<8x128xf32>
    %c4_37 = arith.constant 4 : index
    %c0_38 = arith.constant 0 : index
    %c0_39 = arith.constant 0 : index
    %51 = vector.load %arg5[%c4_37, %c0_38, %c0_39] : memref<6x1x128xf32, #tpu.memory_space<vmem>>, vector<1x1x128xf32>
    %52 = vector.shape_cast %51 : vector<1x1x128xf32> to vector<1x128xf32>
    %53 = vector.broadcast %52 : vector<1x128xf32> to vector<8x128xf32>
    %54 = arith.addf %50, %53 : vector<8x128xf32>
    %cst_40 = arith.constant 0.000000e+00 : f32
    %55 = vector.broadcast %cst_40 : f32 to vector<8x128xf32>
    %56 = arith.maximumf %54, %55 : vector<8x128xf32>
    %57 = arith.truncf %56 : vector<8x128xf32> to vector<8x128xbf16>
    %c5 = arith.constant 5 : index
    %c0_41 = arith.constant 0 : index
    %c0_42 = arith.constant 0 : index
    %58 = vector.load %arg4[%c5, %c0_41, %c0_42] : memref<6x128x128xbf16, #tpu.memory_space<vmem>>, vector<1x128x128xbf16>
    %59 = vector.shape_cast %58 : vector<1x128x128xbf16> to vector<128x128xbf16>
    %cst_43 = arith.constant dense<0.000000e+00> : vector<8x128xf32>
    %60 = tpu.matmul %57, %59, %cst_43 {dimension_numbers = #tpu.dot_dimension_numbers<[1], [0], [0], [1], [0, 0, 1, 1], [], []>} : vector<8x128xbf16>, vector<128x128xbf16>, vector<8x128xf32> -> vector<8x128xf32>
    %c5_44 = arith.constant 5 : index
    %c0_45 = arith.constant 0 : index
    %c0_46 = arith.constant 0 : index
    %61 = vector.load %arg5[%c5_44, %c0_45, %c0_46] : memref<6x1x128xf32, #tpu.memory_space<vmem>>, vector<1x1x128xf32>
    %62 = vector.shape_cast %61 : vector<1x1x128xf32> to vector<1x128xf32>
    %63 = vector.broadcast %62 : vector<1x128xf32> to vector<8x128xf32>
    %64 = arith.addf %60, %63 : vector<8x128xf32>
    %cst_47 = arith.constant 0.000000e+00 : f32
    %65 = vector.broadcast %cst_47 : f32 to vector<8x128xf32>
    %66 = arith.maximumf %64, %65 : vector<8x128xf32>
    %67 = arith.truncf %66 : vector<8x128xf32> to vector<8x128xbf16>
    %c0_48 = arith.constant 0 : index
    %c0_49 = arith.constant 0 : index
    %68 = vector.load %arg6[%c0_48, %c0_49] : memref<128x128xbf16, #tpu.memory_space<vmem>>, vector<128x128xbf16>
    %cst_50 = arith.constant dense<0.000000e+00> : vector<8x128xf32>
    %69 = tpu.matmul %67, %68, %cst_50 {dimension_numbers = #tpu.dot_dimension_numbers<[1], [0], [0], [1], [0, 0, 1, 1], [], []>} : vector<8x128xbf16>, vector<128x128xbf16>, vector<8x128xf32> -> vector<8x128xf32>
    %c0_51 = arith.constant 0 : index
    %c0_52 = arith.constant 0 : index
    %70 = vector.load %arg7[%c0_51, %c0_52] : memref<1x128xf32, #tpu.memory_space<vmem>>, vector<1x128xf32>
    %71 = vector.broadcast %70 : vector<1x128xf32> to vector<8x128xf32>
    %72 = arith.addf %69, %71 : vector<8x128xf32>
    %73 = tpu.iota {dimensions = array<i32: 1>} : vector<8x128xi32>
    %cst_53 = arith.constant -2.000000e+01 : f32
    %cst_54 = arith.constant 2.000000e+00 : f32
    %74 = vector.broadcast %cst_53 : f32 to vector<8x128xf32>
    %75 = arith.maximumf %74, %72 : vector<8x128xf32>
    %76 = vector.broadcast %cst_54 : f32 to vector<8x128xf32>
    %77 = arith.minimumf %76, %75 : vector<8x128xf32>
    %78 = math.exp %77 : vector<8x128xf32>
    %c12_i32 = arith.constant 12 : i32
    %79 = vector.broadcast %c12_i32 : i32 to vector<8x128xi32>
    %80 = arith.cmpi sge, %73, %79 : vector<8x128xi32>
    %81 = arith.select %80, %78, %72 : vector<8x128xi1>, vector<8x128xf32>
    %c0_55 = arith.constant 0 : index
    %c0_56 = arith.constant 0 : index
    %82 = vector.load %arg8[%c0_55, %c0_56] : memref<8x128xf32, #tpu.memory_space<vmem>>, vector<8x128xf32>
    tpu.vector_store %arg8[%c0_55, %c0_56], %81 {strides = array<i32>} : memref<8x128xf32, #tpu.memory_space<vmem>>, vector<8x128xf32>,
    return
  }
  func.func @transform_0(%arg0: i32) -> (i32, i32) {
    %c0_i32 = arith.constant 0 : i32
    %c0_i32_0 = arith.constant 0 : i32
    return %arg0, %c0_i32 : i32, i32
  }
  func.func @transform_1(%arg0: i32) -> (i32, i32) {
    %c0_i32 = arith.constant 0 : i32
    %c0_i32_0 = arith.constant 0 : i32
    %c0_i32_1 = arith.constant 0 : i32
    return %c0_i32, %c0_i32_0 : i32, i32
  }
  func.func @transform_2(%arg0: i32) -> (i32, i32) {
    %c0_i32 = arith.constant 0 : i32
    %c0_i32_0 = arith.constant 0 : i32
    %c0_i32_1 = arith.constant 0 : i32
    return %c0_i32, %c0_i32_0 : i32, i32
  }
  func.func @transform_3(%arg0: i32) -> (i32, i32, i32) {
    %c0_i32 = arith.constant 0 : i32
    %c0_i32_0 = arith.constant 0 : i32
    %c0_i32_1 = arith.constant 0 : i32
    %c0_i32_2 = arith.constant 0 : i32
    return %c0_i32, %c0_i32_0, %c0_i32_1 : i32, i32, i32
  }
  func.func @transform_4(%arg0: i32) -> (i32, i32, i32) {
    %c0_i32 = arith.constant 0 : i32
    %c0_i32_0 = arith.constant 0 : i32
    %c0_i32_1 = arith.constant 0 : i32
    %c0_i32_2 = arith.constant 0 : i32
    return %c0_i32, %c0_i32_0, %c0_i32_1 : i32, i32, i32
  }
  func.func @transform_5(%arg0: i32) -> (i32, i32) {
    %c0_i32 = arith.constant 0 : i32
    %c0_i32_0 = arith.constant 0 : i32
    %c0_i32_1 = arith.constant 0 : i32
    return %c0_i32, %c0_i32_0 : i32, i32
  }
  func.func @transform_6(%arg0: i32) -> (i32, i32) {
    %c0_i32 = arith.constant 0 : i32
    %c0_i32_0 = arith.constant 0 : i32
    %c0_i32_1 = arith.constant 0 : i32
    return %c0_i32, %c0_i32_0 : i32, i32
  }
  func.func @transform_7(%arg0: i32) -> (i32, i32) {
    %c0_i32 = arith.constant 0 : i32
    %c0_i32_0 = arith.constant 0 : i32
    return %arg0, %c0_i32 : i32, i32
  }
}

</mosaic_0001>

<bundles_post_ra>
// kernel: skill_prior_forward.1
= control target key start
LH: loop header
LB: loop body
LE: loop exit
PB: predicated region body
PF: predicated region fallthrough
CT: control target
= control target key end

     0   :  { %12 = vsyncpa [#allocation3], 0  ;;  %s1217_s0 = inlined_call_operand.vmem [shape: f32[8,16], index: 0, kind: input, shape index: {}]   ;;  %s1218_s1 = inlined_call_operand.vmem [shape: bf16[16,128], index: 1, kind: input, shape index: {}]   ;;  %s1219_s2 = inlined_call_operand.hbm [shape: f32[1,128], index: 2, kind: input, shape index: {}]   ;;  %s1220_s3 = inlined_call_operand.hbm [shape: bf16[6,128,128], index: 3, kind: input, shape index: {}]   ;;  %s1221_s4 = inlined_call_operand.vmem [shape: f32[6,1,128], index: 4, kind: input, shape index: {}]   ;;  %s1222_s5 = inlined_call_operand.hbm [shape: bf16[128,128], index: 5, kind: input, shape index: {}]   ;;  %s1223_s6 = inlined_call_operand.hbm [shape: f32[1,128], index: 6, kind: input, shape index: {}]   ;;  %s1224_s7 = inlined_call_operand.vmem [shape: f32[8,128], index: 7, kind: output, shape index: {}]  }
   0x1   :  { %13 = vsyncpa [#allocation5], 0  ;;  %s34_s26 = sshll.u32 %s1220_s3, 4  ;;  %s35_s26 = int_to_ptr.hbm [resolvable:$true] %s34_s26 }
   0x2   :  { %14 = vsyncpa [#allocation8], 0  ;;  %s1132_s27 = smov [#allocation4]   ;;  %s24_s8 = sshll.u32 %s1219_s2, 4  ;;  %s25_s8 = int_to_ptr.hbm [resolvable:$true] %s24_s8 }
   0x3   :  { %s36_s28 = sshll.u32 %s1132_s27, 4  ;;  %s1133_s9 = smov 64   ;;  %s37_s28 = int_to_ptr.vmem [resolvable:$true] %s36_s28 }
   0x4   :  { %s1134_s10 = smov 4   ;;  %s1135_s11 = smov [#allocation2]  }
   0x5   :  { %42 = dma.hbm_to_vmem [thread:$0]  %s35_s26, 6144, %s37_s28, [#allocation5], %s1133_s9, %s1133_s9, %s1134_s10  }
   0x6   :  { %s26_s12 = sshll.u32 %s1135_s11, 4  ;;  %s49_s15 = sshll.u32 %s1222_s5, 4  ;;  %s27_s12 = int_to_ptr.vmem [resolvable:$true] %s26_s12  ;;  %s50_s15 = int_to_ptr.hbm [resolvable:$true] %s49_s15 }
   0x7   :  { %29 = dma.hbm_to_vmem [thread:$0]  %s25_s8, 16, %s27_s12, [#allocation3]  }
   0x8   :  { %s63_s17 = sshll.u32 %s1223_s6, 4  ;;  %s1136_s18 = smov [#allocation6]   ;;  %s64_s17 = int_to_ptr.hbm [resolvable:$true] %s63_s17 }
   0x9   :  { %s51_s19 = sshll.u32 %s1136_s18, 4  ;;  %s1137_s2 = smov [#allocation7]   ;;  %s52_s19 = int_to_ptr.vmem [resolvable:$true] %s51_s19 }
   0xa   :  { %57 = dma.hbm_to_vmem [thread:$0]  %s50_s15, 1024, %s52_s19, [#allocation5], %s1133_s9, %s1133_s9, %s1134_s10  }
   0xb   :  { %s65_s20 = sshll.u32 %s1137_s2, 4  ;;  %s66_s20 = int_to_ptr.vmem [resolvable:$true] %s65_s20 }
   0xc   :  { %68 = dma.hbm_to_vmem [thread:$0]  %s64_s17, 16, %s66_s20, [#allocation8]  }
   0xd   :  { %1126 = dma.done.wait [#allocation3], 16  }
   0xe   :  { %1127 = vsyncadd [#allocation3], 4294967280 }
   0xf   :  { %1128 = dma.done.wait [#allocation5], 7168  }
  0x10   :  { %1129 = vsyncadd [#allocation5], 4294960128 }
  0x11   :  { %1130 = dma.done.wait [#allocation8], 16  }
  0x12   :  { %1131 = vsyncadd [#allocation8], 4294967280  ;;  %v957_v0 = vld [vmem:[%s1218_s1] sm:$0xff]  ;;  %vm100_vm0 = vcmask 130048   ;;  %v964_v4 = vld [vmem:[#allocation4 + $0x30] sm:$0xff] }
  0x13   :  { %v86_v1 = vld [vmem:[%s1217_s0] sm:$0xff]  ;;  %111 = vmatpush.bf16.msra.mxu0 %v957_v0  ;;  %v963_v5 = vld [vmem:[#allocation4 + $0x28] sm:$0xff]  ;;  %v960_v8 = vld [vmem:[#allocation4 + $0x10] sm:$0xff] }
  0x14   :  { %v965_v2 = vld [vmem:[#allocation4 + $0x38] sm:$0xff]  ;;  %v87_v3 = vpack.c.bf16 %v86_v1, %v86_v1  ;;  %v962_v6 = vld [vmem:[#allocation4 + $0x20] sm:$0xff]  ;;  %v959_v9 = vld [vmem:[#allocation4 + $0x8] sm:$0xff] }
  0x15   :  { %186 = vmatpush.bf16.msra.mxu1 %v965_v2  ;;  %v961_v7 = vld [vmem:[#allocation4 + $0x18] sm:$0xff]  ;;  %v958_v10 = vld [vmem:[#allocation4] sm:$0xff]  ;;  %v972_v12 = vld [vmem:[#allocation4 + $0x70] sm:$0xff] }
  0x16   :  { %727 = vmatmul.msk.bf16.vlgmr.msra.gmra.mxu0 %vm100_vm0, %v87_v3  ;;  %v973_v11 = vld [vmem:[#allocation4 + $0x78] sm:$0xff]  ;;  %v971_v13 = vld [vmem:[#allocation4 + $0x68] sm:$0xff]  ;;  %v970_v14 = vld [vmem:[#allocation4 + $0x60] sm:$0xff] }
  0x17   :  { %271 = vmatpush.bf16.msra.mxu2 %v973_v11  ;;  %v969_v15 = vld [vmem:[#allocation4 + $0x58] sm:$0xff]  ;;  %v968_v16 = vld [vmem:[#allocation4 + $0x50] sm:$0xff]  ;;  %v967_v22 = vld [vmem:[#allocation4 + $0x48] sm:$0xff] }
  0x18   :  { %v1020_v17 = vld [vmem:[#allocation2] ss:$0 sm:$0xff]  ;;  %v966_v23 = vld [vmem:[#allocation4 + $0x40] sm:$0xff]  ;;  %v980_v25 = vld [vmem:[#allocation4 + $0xb0] sm:$0xff] }
  0x19   :  { %187 = vmatpush.bf16.msra.mxu1 %v964_v4  ;;  %v981_v24 = vld [vmem:[#allocation4 + $0xb8] sm:$0xff]  ;;  %v979_v26 = vld [vmem:[#allocation4 + $0xa8] sm:$0xff]  ;;  %v978_v27 = vld [vmem:[#allocation4 + $0xa0] sm:$0xff] }
  0x1a   :  { %356 = vmatpush.bf16.msra.mxu3 %v981_v24  ;;  %v977_v28 = vld [vmem:[#allocation4 + $0x98] sm:$0xff]  ;;  %v976_v29 = vld [vmem:[#allocation4 + $0x90] sm:$0xff]  ;;  %v975_v36 = vld [vmem:[#allocation4 + $0x88] sm:$0xff] }
  0x1b   :  { %272 = vmatpush.bf16.msra.mxu2 %v972_v12  ;;  %v1021_v30 = vld [vmem:[%s1221_s4] ss:$0 sm:$0xff]  ;;  %v974_v37 = vld [vmem:[#allocation4 + $0x80] sm:$0xff]  ;;  %v988_v39 = vld [vmem:[#allocation4 + $0xf0] sm:$0xff] }
  0x1c   :  { %v989_v38 = vld [vmem:[#allocation4 + $0xf8] sm:$0xff]  ;;  %v987_v40 = vld [vmem:[#allocation4 + $0xe8] sm:$0xff]  ;;  %v986_v41 = vld [vmem:[#allocation4 + $0xe0] sm:$0xff] }
  0x1d   :  { %188 = vmatpush.bf16.msra.mxu1 %v963_v5  ;;  %441 = vmatpush.bf16.msrb.mxu0 %v989_v38  ;;  %v985_v42 = vld [vmem:[#allocation4 + $0xd8] sm:$0xff]  ;;  %v984_v43 = vld [vmem:[#allocation4 + $0xd0] sm:$0xff]  ;;  %v983_v50 = vld [vmem:[#allocation4 + $0xc8] sm:$0xff] }
  0x1e   :  { %357 = vmatpush.bf16.msra.mxu3 %v980_v25  ;;  %v1022_v44 = vld [vmem:[%s1221_s4 + $0x1] ss:$0 sm:$0xff]  ;;  %v982_v51 = vld [vmem:[#allocation4 + $0xc0] sm:$0xff]  ;;  %v996_v53 = vld [vmem:[#allocation4 + $0x130] sm:$0xff] }
  0x1f   :  { %273 = vmatpush.bf16.msra.mxu2 %v971_v13  ;;  %v997_v52 = vld [vmem:[#allocation4 + $0x138] sm:$0xff]  ;;  %v995_v54 = vld [vmem:[#allocation4 + $0x128] sm:$0xff]  ;;  %v994_v55 = vld [vmem:[#allocation4 + $0x120] sm:$0xff] }
  0x20   :  { %v993_v56 = vld [vmem:[#allocation4 + $0x118] sm:$0xff]  ;;  %v992_v57 = vld [vmem:[#allocation4 + $0x110] sm:$0xff]  ;;  %v1023_v58 = vld [vmem:[%s1221_s4 + $0x2] ss:$0 sm:$0xff] }
  0x21   :  { %189 = vmatpush.bf16.msra.mxu1 %v962_v6  ;;  %442 = vmatpush.bf16.msrb.mxu0 %v988_v39  ;;  %v991_v0 = vld [vmem:[#allocation4 + $0x108] sm:$0xff]  ;;  %v990_v1 = vld [vmem:[#allocation4 + $0x100] sm:$0xff]  ;;  %v1005_v2 = vld [vmem:[#allocation4 + $0x178] sm:$0xff] }
  0x22   :  { %358 = vmatpush.bf16.msra.mxu3 %v979_v26  ;;  %v1004_v3 = vld [vmem:[#allocation4 + $0x170] sm:$0xff]  ;;  %v1003_v4 = vld [vmem:[#allocation4 + $0x168] sm:$0xff]  ;;  %v1002_v5 = vld [vmem:[#allocation4 + $0x160] sm:$0xff] }
  0x23   :  { %274 = vmatpush.bf16.msra.mxu2 %v970_v14  ;;  %v1001_v6 = vld [vmem:[#allocation4 + $0x158] sm:$0xff]  ;;  %v999_v14 = vld [vmem:[#allocation4 + $0x148] sm:$0xff] }
  0x25   :  { %190 = vmatpush.bf16.msra.mxu1 %v961_v7  ;;  %443 = vmatpush.bf16.msrb.mxu0 %v987_v40  ;;  %v1000_v7 = vld [vmem:[#allocation4 + $0x150] sm:$0xff]  ;;  %v707_v40 = vlaneseq }
  0x26   :  { %359 = vmatpush.bf16.msra.mxu3 %v978_v27 }
  0x27   :  { %275 = vmatpush.bf16.msra.mxu2 %v969_v15  ;;  %v998_v15 = vld [vmem:[#allocation4 + $0x140] sm:$0xff] }
  0x29   :  { %191 = vmatpush.bf16.msra.mxu1 %v960_v8  ;;  %444 = vmatpush.bf16.msrb.mxu0 %v986_v41  ;;  %v1024_v8 = vld [vmem:[%s1221_s4 + $0x3] ss:$0 sm:$0xff] }
  0x2a   :  { %360 = vmatpush.bf16.msra.mxu3 %v977_v28  ;;  %v1007_v28 = vld [vmem:[#allocation6 + $0x8] sm:$0xff] }
  0x2b   :  { %276 = vmatpush.bf16.msra.mxu2 %v968_v16  ;;  %v1013_v16 = vld [vmem:[#allocation6 + $0x38] sm:$0xff] }
  0x2d   :  { %192 = vmatpush.bf16.msra.mxu1 %v959_v9  ;;  %445 = vmatpush.bf16.msrb.mxu0 %v985_v42 }
  0x2e   :  { %361 = vmatpush.bf16.msra.mxu3 %v976_v29  ;;  %v1006_v29 = vld [vmem:[#allocation6] sm:$0xff] }
  0x2f   :  { %277 = vmatpush.bf16.msra.mxu2 %v967_v22  ;;  %v1025_v22 = vld [vmem:[%s1221_s4 + $0x4] ss:$0 sm:$0xff] }
  0x31   :  { %193 = vmatpush.bf16.msra.mxu1 %v958_v10  ;;  %446 = vmatpush.bf16.msrb.mxu0 %v984_v43 }
  0x32   :  { %362 = vmatpush.bf16.msra.mxu3 %v975_v36  ;;  %v1027_v36 = vld [vmem:[#allocation7] ss:$0 sm:$0xff] }
  0x33   :  { %278 = vmatpush.bf16.msra.mxu2 %v966_v23 }
  0x35   :  { %447 = vmatpush.bf16.msrb.mxu0 %v983_v50  ;;  %526 = vmatpush.bf16.msrb.mxu1 %v997_v52 }
  0x36   :  { %363 = vmatpush.bf16.msra.mxu3 %v974_v37 }
  0x37   :  { %611 = vmatpush.bf16.msrb.mxu2 %v1005_v2 }
  0x39   :  { %448 = vmatpush.bf16.msrb.mxu0 %v982_v51  ;;  %527 = vmatpush.bf16.msrb.mxu1 %v996_v53 }
  0x3a   :  { %694 = vmatpush.bf16.msrb.mxu3 %v1013_v16 }
  0x3b   :  { %612 = vmatpush.bf16.msrb.mxu2 %v1004_v3 }
  0x3d   :  { %528 = vmatpush.bf16.msrb.mxu1 %v995_v54 }
  0x3f   :  { %613 = vmatpush.bf16.msrb.mxu2 %v1003_v4 }
  0x41   :  { %529 = vmatpush.bf16.msrb.mxu1 %v994_v55 }
  0x43   :  { %614 = vmatpush.bf16.msrb.mxu2 %v1002_v5 }
  0x45   :  { %530 = vmatpush.bf16.msrb.mxu1 %v993_v56 }
  0x47   :  { %615 = vmatpush.bf16.msrb.mxu2 %v1001_v6 }
  0x49   :  { %531 = vmatpush.bf16.msrb.mxu1 %v992_v57 }
  0x4b   :  { %616 = vmatpush.bf16.msrb.mxu2 %v1000_v7 }
  0x4d   :  { %532 = vmatpush.bf16.msrb.mxu1 %v991_v0 }
  0x4f   :  { %617 = vmatpush.bf16.msrb.mxu2 %v999_v14 }
  0x51   :  { %533 = vmatpush.bf16.msrb.mxu1 %v990_v1 }
  0x53   :  { %618 = vmatpush.bf16.msrb.mxu2 %v998_v15 }
  0x93   :  { %v113_v18 = vpop.f32.mrf.mxu0 }
  0x94   :  { %v114_v19 = vadd.f32 %v1020_v17, %v113_v18  ;;  %v1012_v17 = vld [vmem:[#allocation6 + $0x30] sm:$0xff]  ;;  %v1011_v18 = vld [vmem:[#allocation6 + $0x28] sm:$0xff] }
  0x95   :  { %695 = vmatpush.bf16.msrb.mxu3 %v1012_v17 }
  0x96   :  { %v117_v20 = vpack.c.bf16 %v114_v19, %v114_v19  ;;  %v1010_v19 = vld [vmem:[#allocation6 + $0x20] sm:$0xff] }
  0x98   :  { %194 = vmatmul.bf16.vlgmr.msra.gmra.mxu1 %v117_v20  ;;  %v1009_v20 = vld [vmem:[#allocation6 + $0x18] sm:$0xff] }
  0x99   :  { %696 = vmatpush.bf16.msrb.mxu3 %v1011_v18 }
  0x9b   :  { %v115_v21 = vpop.f32.mrf.mxu0 }
  0x9c   :  { %v1008_v21 = vld [vmem:[#allocation6 + $0x10] sm:$0xff] }
  0x9d   :  { %697 = vmatpush.bf16.msrb.mxu3 %v1010_v19 }
  0xa1   :  { %698 = vmatpush.bf16.msrb.mxu3 %v1009_v20 }
  0xa5   :  { %699 = vmatpush.bf16.msrb.mxu3 %v1008_v21 }
  0xa9   :  { %700 = vmatpush.bf16.msrb.mxu3 %v1007_v28 }
  0xad   :  { %701 = vmatpush.bf16.msrb.mxu3 %v1006_v29 }
 0x115   :  { %v195_v31 = vpop.f32.mrf.mxu1 }
 0x116   :  { %v196_v32 = vadd.f32 %v1021_v30, %v195_v31  ;;  %v1026_v30 = vld [vmem:[%s1221_s4 + $0x5] ss:$0 sm:$0xff] }
 0x118   :  { %v199_v33 = vmax.f32 %v196_v32, 0.0 }
 0x11a   :  { %v200_v34 = vpack.c.bf16 %v199_v33, %v199_v33 }
 0x11c   :  { %279 = vmatmul.bf16.vlgmr.msra.gmra.mxu2 %v200_v34 }
 0x11d   :  { %v197_v35 = vpop.f32.mrf.mxu1 }
 0x19f   :  { %v280_v45 = vpop.f32.mrf.mxu2 }
 0x1a0   :  { %v281_v46 = vadd.f32 %v1022_v44, %v280_v45  ;;  %v708_v44 = vand.u32 127, %v707_v40 }
 0x1a2   :  { %v284_v47 = vmax.f32 %v281_v46, 0.0  ;;  %vm713_vm1 = vcmp.ge.s32.totalorder %v708_v44, 12 }
 0x1a4   :  { %v285_v48 = vpack.c.bf16 %v284_v47, %v284_v47 }
 0x1a6   :  { %364 = vmatmul.bf16.vlgmr.msra.gmra.mxu3 %v285_v48 }
 0x1a7   :  { %v282_v49 = vpop.f32.mrf.mxu2 }
 0x229   :  { %v365_v59 = vpop.f32.mrf.mxu3 }
 0x22a   :  { %v366_v60 = vadd.f32 %v1023_v58, %v365_v59 }
 0x22c   :  { %v369_v61 = vmax.f32 %v366_v60, 0.0 }
 0x22e   :  { %v370_v62 = vpack.c.bf16 %v369_v61, %v369_v61 }
 0x230   :  { %449 = vmatmul.bf16.vlgmr.msrb.gmra.mxu0 %v370_v62 }
 0x231   :  { %v367_v63 = vpop.f32.mrf.mxu3 }
 0x2ad   :  { %v450_v9 = vpop.f32.mrf.mxu0 }
 0x2ae   :  { %v451_v10 = vadd.f32 %v1024_v8, %v450_v9 }
 0x2b0   :  { %v454_v11 = vmax.f32 %v451_v10, 0.0 }
 0x2b2   :  { %v455_v12 = vpack.c.bf16 %v454_v11, %v454_v11 }
 0x2b4   :  { %534 = vmatmul.bf16.vlgmr.msrb.gmra.mxu1 %v455_v12 }
 0x2b5   :  { %v452_v13 = vpop.f32.mrf.mxu0 }
 0x331   :  { %v535_v23 = vpop.f32.mrf.mxu1 }
 0x332   :  { %v536_v24 = vadd.f32 %v1025_v22, %v535_v23 }
 0x334   :  { %v539_v25 = vmax.f32 %v536_v24, 0.0 }
 0x336   :  { %v540_v26 = vpack.c.bf16 %v539_v25, %v539_v25 }
 0x338   :  { %619 = vmatmul.bf16.vlgmr.msrb.gmra.mxu2 %v540_v26 }
 0x339   :  { %v537_v27 = vpop.f32.mrf.mxu1 }
 0x3bb   :  { %v620_v31 = vpop.f32.mrf.mxu2 }
 0x3bc   :  { %v621_v32 = vadd.f32 %v1026_v30, %v620_v31 }
 0x3be   :  { %v624_v33 = vmax.f32 %v621_v32, 0.0 }
 0x3c0   :  { %v625_v34 = vpack.c.bf16 %v624_v33, %v624_v33 }
 0x3c2   :  { %702 = vmatmul.bf16.vlgmr.msrb.gmra.mxu3 %v625_v34 }
 0x3c3   :  { %v622_v35 = vpop.f32.mrf.mxu2 }
 0x445   :  { %v703_v37 = vpop.f32.mrf.mxu3 }
 0x446   :  { %v704_v38 = vadd.f32 %v1027_v36, %v703_v37 }
 0x448   :  { %v709_v39 = vmax.f32 %v704_v38, -20.0 }
 0x44a   :  { %v710_v41 = vmin.f32 %v709_v39, 2.0 }
 0x44c   :  { %v711_v42 = vmul.f32 1.442695, %v710_v41 }
 0x44d   :  { %v705_v43 = vpop.f32.mrf.mxu3 }
 0x44e   :  { %1028 = vpow2.f32 %v711_v42 }
 0x454   :  { %v1029_v45 = vpop.eup %1028 }
 0x455   :  { %v714_v46 = vsel %vm713_vm1, %v1029_v45, %v704_v38 }
 0x456   :  { %715 = vst [vmem:[%s1224_s7] sm:$0xff] %v714_v46 }
 0x457   :  { %720 = vsyncpa [#allocation3], 1 }
 0x458   :  { %721 = vsyncpa [#allocation5], 1 }
 0x459   :  { %722 = vsyncpa [#allocation8], 1 }

</bundles_post_ra>
